<compile_context>
chip_gen: v6e
topology: v6e:2x2x1
jax: 0.10.0
libtpu: 0.0.40
codegen_flags: <defaults>
</compile_context>

<pallas_src>
from functools import partial

import jax
import jax.numpy as jnp
from jax.experimental import pallas as pl
from jax.experimental.pallas import tpu as pltpu

LANE = 128
ROW_TILE = 8 * LANE                       # one (8,128) f32 vreg tile = 1024 elems
TARGET_TILE_BYTES = 8 * 1024 * 1024       # per input block (double-buffered)
VMEM_LIMIT_BYTES = 40 * 1024 * 1024       # fits v5e/v6e (128 MiB) and v7x (64 MiB)


def _make_kernel(rows_total, block_rows):
    block_vregs = block_rows // 8

    def softplus_neg(x):
        # numerically stable softplus(-x) = max(-x, 0) + log1p(exp(-|x|))
        z = -x
        return jnp.maximum(z, 0.0) + jnp.log1p(jnp.exp(-jnp.abs(z)))

    def kernel(x_ref, out_ref, acc_ref):
        c = pl.program_id(0)
        i = pl.program_id(1)
        steps = pl.num_programs(1)
        base_row = (c * steps + i) * block_rows   # logical (unclamped) row offset

        @pl.when(i == 0)
        def _():
            acc_ref[...] = jnp.zeros_like(acc_ref)

        # Fast path: fully valid interior block — no mask work (VPU/EUP only).
        @pl.when(base_row + block_rows <= rows_total)
        def _():
            sp = softplus_neg(x_ref[...].astype(jnp.float32))
            acc_ref[...] += sp.reshape(block_vregs, 8, LANE).sum(axis=0)

        # Boundary block: select-out rows past the valid data (the overhanging
        # part of the VMEM buffer is stale/garbage).  Fully-clamped duplicate
        # blocks (base_row >= rows_total) skip compute entirely.
        @pl.when((base_row < rows_total) & (base_row + block_rows > rows_total))
        def _():
            sp = softplus_neg(x_ref[...].astype(jnp.float32))
            row_idx = base_row + jax.lax.broadcasted_iota(
                jnp.int32, (block_rows, LANE), 0)
            sp = jnp.where(row_idx < rows_total, sp, 0.0)
            acc_ref[...] += sp.reshape(block_vregs, 8, LANE).sum(axis=0)

        @pl.when(i == steps - 1)
        def _():
            out_ref[...] = acc_ref[...].reshape(1, 8, LANE)

    return kernel


def _pick_block_rows(rows, itemsize, max_tile_bytes):
    """Pick rows-per-block (multiple of 8) and the VMEM limit, in bytes."""
    try:
        vmem_cap = pltpu.get_tpu_info().vmem_capacity_bytes
    except Exception:
        vmem_cap = 64 * 1024 * 1024
    vmem_limit = min(VMEM_LIMIT_BYTES, (vmem_cap * 3) // 4)
    tile_bytes = min(max_tile_bytes, vmem_limit // 4)   # 2x buffered << limit
    max_rows = max(8, (tile_bytes // (LANE * itemsize)) // 8 * 8)
    return min(rows, max_rows), vmem_limit


@partial(jax.jit, static_argnames=("max_tile_bytes",))
def advg_loss(fake_pred, max_tile_bytes=TARGET_TILE_BYTES):
    """Pallas TPU implementation of AdvGLoss.forward."""
    x = jnp.asarray(fake_pred)
    n = x.size
    flat = x.reshape(-1)                      # free for contiguous input, no cast
    n_main = (n // ROW_TILE) * ROW_TILE       # largest multiple of 1024 elements

    tail_sum = jnp.float32(0.0)
    if n_main < n:
        # <= 1023 ragged elements: handled here instead of a jnp.pad HBM copy.
        tail = flat[n_main:].astype(jnp.float32)
        tail_sum = jnp.sum(jax.nn.softplus(-tail))

    if n_main == 0:
        return tail_sum / jnp.float32(n)

    slab = flat[:n_main].reshape(-1, LANE)    # lane-dense (rows, 128), rows % 8 == 0
    rows = slab.shape[0]
    block_rows, vmem_limit = _pick_block_rows(rows, slab.dtype.itemsize,
                                              max_tile_bytes)

    total_blocks = pl.cdiv(rows, block_rows)
    # 2-way split only when any clamped-duplicate block is negligible; on
    # single-TC chips the leading axis is just a serial loop so keep it cheap.
    num_splits = 2 if (total_blocks >= 2 and
                       (total_blocks % 2 == 0 or total_blocks >= 8)) else 1
    blocks_per_split = pl.cdiv(total_blocks, num_splits)
    last_block = total_blocks - 1

    def in_map(c, i):
        # clamp so the DMA source stays in bounds; clamped duplicate blocks
        # contribute nothing (skipped in-kernel via base_row >= rows check).
        return (jnp.minimum(c * blocks_per_split + i, last_block), 0)

    partials = pl.pallas_call(
        _make_kernel(rows, block_rows),
        out_shape=jax.ShapeDtypeStruct((num_splits, 8, LANE), jnp.float32),
        grid_spec=pltpu.PrefetchScalarGridSpec(
            num_scalar_prefetch=0,
            grid=(num_splits, blocks_per_split),
            in_specs=[pl.BlockSpec((block_rows, LANE), in_map)],
            out_specs=pl.BlockSpec((1, 8, LANE), lambda c, i: (c, 0, 0)),
            scratch_shapes=[pltpu.VMEM((8, LANE), jnp.float32)],
        ),
        compiler_params=pltpu.CompilerParams(
            # TODO(synk): on v7x, verify the leading "parallel" axis really
            # shards across the 2 TensorCores (else switch to CORE_PARALLEL).
            dimension_semantics=("parallel", "arbitrary"),
            vmem_limit_bytes=vmem_limit,
        ),
    )(slab)

    return (jnp.sum(partials) + tail_sum) / jnp.float32(n)


def _advg_loss_ref(fake_pred):
    x = jnp.asarray(fake_pred).astype(jnp.float32)
    return jnp.mean(jax.nn.softplus(-x))


if __name__ == "__main__":
    key = jax.random.PRNGKey(0)
    # small discriminator-logit-like input, NCHW
    fake_pred = jax.random.normal(key, (2, 4, 16, 16), dtype=jnp.float32)

    loss = jax.block_until_ready(advg_loss(fake_pred))
    ref = jax.block_until_ready(_advg_loss_ref(fake_pred))
    assert jnp.allclose(loss, ref, rtol=1e-6, atol=1e-6), (loss, ref)

    # ragged size + tiny forced tile: exercises the boundary-mask path, the
    # 2-way split with clamped index_map, and the pad-free wrapper tail.
    ragged = jax.random.normal(jax.random.PRNGKey(1), (3109,), dtype=jnp.float32)
    loss_r = jax.block_until_ready(advg_loss(ragged, max_tile_bytes=8192))
    ref_r = jax.block_until_ready(_advg_loss_ref(ragged))
    assert jnp.allclose(loss_r, ref_r, rtol=1e-6, atol=1e-6), (loss_r, ref_r)

    print("KERNEL_OK")
</pallas_src>

<mosaic_0001>
module attributes {stable_mosaic.version = 11 : i64} {
  func.func @kernel(%arg0: i32, %arg1: i32, %arg2: memref<16x128xf32, #tpu.memory_space<vmem>>, %arg3: memref<1x8x128xf32, #tpu.memory_space<vmem>>, %arg4: memref<8x128xf32, #tpu.memory_space<vmem>>) attributes {dimension_semantics = [#tpu.dimension_semantics<parallel>, #tpu.dimension_semantics<arbitrary>], iteration_bounds = array<i64: 1, 1>, scalar_prefetch = 0 : i64, scratch_operands = 1 : i64, tpu.core_type = #tpu.core_type<tc>, window_params = [{transform_indices = @transform_0, window_bounds = array<i64: 16, 128>}, {transform_indices = @transform_1, window_bounds = array<i64: 1, 8, 128>}]} {
    %c1_i32 = arith.constant 1 : i32
    %0 = arith.muli %arg0, %c1_i32 : i32
    %1 = arith.addi %0, %arg1 : i32
    %c16_i32 = arith.constant 16 : i32
    %2 = arith.muli %1, %c16_i32 : i32
    %c0_i32 = arith.constant 0 : i32
    %3 = arith.cmpi eq, %arg1, %c0_i32 : i32
    %4 = arith.extui %3 : i1 to i32
    %c0_i32_0 = arith.constant 0 : i32
    %5 = arith.cmpi ne, %4, %c0_i32_0 : i32
    scf.if %5 {
      %cst = arith.constant 0.000000e+00 : f32
      %19 = vector.broadcast %cst : f32 to vector<8x128xf32>
      %c0 = arith.constant 0 : index
      %c0_10 = arith.constant 0 : index
      %20 = vector.load %arg4[%c0, %c0_10] : memref<8x128xf32, #tpu.memory_space<vmem>>, vector<8x128xf32>
      tpu.vector_store %arg4[%c0, %c0_10], %19 {strides = array<i32>} : memref<8x128xf32, #tpu.memory_space<vmem>>, vector<8x128xf32>,
    } else {
    }
    %c16_i32_1 = arith.constant 16 : i32
    %6 = arith.addi %2, %c16_i32_1 : i32
    %c16_i32_2 = arith.constant 16 : i32
    %7 = arith.cmpi sle, %6, %c16_i32_2 : i32
    %8 = arith.extui %7 : i1 to i32
    %c0_i32_3 = arith.constant 0 : i32
    %9 = arith.cmpi ne, %8, %c0_i32_3 : i32
    scf.if %9 {
      %c0 = arith.constant 0 : index
      %c0_10 = arith.constant 0 : index
      %19 = vector.load %arg2[%c0, %c0_10] : memref<16x128xf32, #tpu.memory_space<vmem>>, vector<16x128xf32>
      %cst = arith.constant 0.000000e+00 : f32
      %20 = vector.broadcast %cst : f32 to vector<16x128xf32>
      %21 = arith.subf %20, %19 : vector<16x128xf32>
      %cst_11 = arith.constant 0.000000e+00 : f32
      %22 = vector.broadcast %cst_11 : f32 to vector<16x128xf32>
      %23 = arith.maximumf %21, %22 : vector<16x128xf32>
      %24 = math.absf %21 : vector<16x128xf32>
      %cst_12 = arith.constant 0.000000e+00 : f32
      %25 = vector.broadcast %cst_12 : f32 to vector<16x128xf32>
      %26 = arith.subf %25, %24 : vector<16x128xf32>
      %27 = math.exp %26 : vector<16x128xf32>
      %28 = math.log1p %27 : vector<16x128xf32>
      %29 = arith.addf %23, %28 : vector<16x128xf32>
      %c0_13 = arith.constant 0 : index
      %c0_14 = arith.constant 0 : index
      %30 = vector.load %arg4[%c0_13, %c0_14] : memref<8x128xf32, #tpu.memory_space<vmem>>, vector<8x128xf32>
      %31 = vector.shape_cast %29 : vector<16x128xf32> to vector<2x8x128xf32>
      %cst_15 = arith.constant dense<0.000000e+00> : vector<8x128xf32>
      %32 = vector.multi_reduction <add>, %31, %cst_15 [0] : vector<2x8x128xf32> to vector<8x128xf32>
      %33 = arith.addf %30, %32 : vector<8x128xf32>
      %c0_16 = arith.constant 0 : index
      %c0_17 = arith.constant 0 : index
      %34 = vector.load %arg4[%c0_16, %c0_17] : memref<8x128xf32, #tpu.memory_space<vmem>>, vector<8x128xf32>
      tpu.vector_store %arg4[%c0_16, %c0_17], %33 {strides = array<i32>} : memref<8x128xf32, #tpu.memory_space<vmem>>, vector<8x128xf32>,
    } else {
    }
    %c16_i32_4 = arith.constant 16 : i32
    %10 = arith.cmpi slt, %2, %c16_i32_4 : i32
    %c16_i32_5 = arith.constant 16 : i32
    %11 = arith.addi %2, %c16_i32_5 : i32
    %c16_i32_6 = arith.constant 16 : i32
    %12 = arith.cmpi sgt, %11, %c16_i32_6 : i32
    %13 = arith.andi %10, %12 : i1
    %14 = arith.extui %13 : i1 to i32
    %c0_i32_7 = arith.constant 0 : i32
    %15 = arith.cmpi ne, %14, %c0_i32_7 : i32
    scf.if %15 {
      %c0 = arith.constant 0 : index
      %c0_10 = arith.constant 0 : index
      %19 = vector.load %arg2[%c0, %c0_10] : memref<16x128xf32, #tpu.memory_space<vmem>>, vector<16x128xf32>
      %cst = arith.constant 0.000000e+00 : f32
      %20 = vector.broadcast %cst : f32 to vector<16x128xf32>
      %21 = arith.subf %20, %19 : vector<16x128xf32>
      %cst_11 = arith.constant 0.000000e+00 : f32
      %22 = vector.broadcast %cst_11 : f32 to vector<16x128xf32>
      %23 = arith.maximumf %21, %22 : vector<16x128xf32>
      %24 = math.absf %21 : vector<16x128xf32>
      %cst_12 = arith.constant 0.000000e+00 : f32
      %25 = vector.broadcast %cst_12 : f32 to vector<16x128xf32>
      %26 = arith.subf %25, %24 : vector<16x128xf32>
      %27 = math.exp %26 : vector<16x128xf32>
      %28 = math.log1p %27 : vector<16x128xf32>
      %29 = arith.addf %23, %28 : vector<16x128xf32>
      %30 = tpu.iota {dimensions = array<i32: 0>} : vector<16x128xi32>
      %31 = vector.broadcast %2 : i32 to vector<16x128xi32>
      %32 = arith.addi %31, %30 : vector<16x128xi32>
      %c16_i32_13 = arith.constant 16 : i32
      %33 = vector.broadcast %c16_i32_13 : i32 to vector<16x128xi32>
      %34 = arith.cmpi slt, %32, %33 : vector<16x128xi32>
      %cst_14 = arith.constant 0.000000e+00 : f32
      %35 = vector.broadcast %cst_14 : f32 to vector<16x128xf32>
      %36 = arith.select %34, %29, %35 : vector<16x128xi1>, vector<16x128xf32>
      %c0_15 = arith.constant 0 : index
      %c0_16 = arith.constant 0 : index
      %37 = vector.load %arg4[%c0_15, %c0_16] : memref<8x128xf32, #tpu.memory_space<vmem>>, vector<8x128xf32>
      %38 = vector.shape_cast %36 : vector<16x128xf32> to vector<2x8x128xf32>
      %cst_17 = arith.constant dense<0.000000e+00> : vector<8x128xf32>
      %39 = vector.multi_reduction <add>, %38, %cst_17 [0] : vector<2x8x128xf32> to vector<8x128xf32>
      %40 = arith.addf %37, %39 : vector<8x128xf32>
      %c0_18 = arith.constant 0 : index
      %c0_19 = arith.constant 0 : index
      %41 = vector.load %arg4[%c0_18, %c0_19] : memref<8x128xf32, #tpu.memory_space<vmem>>, vector<8x128xf32>
      tpu.vector_store %arg4[%c0_18, %c0_19], %40 {strides = array<i32>} : memref<8x128xf32, #tpu.memory_space<vmem>>, vector<8x128xf32>,
    } else {
    }
    %c0_i32_8 = arith.constant 0 : i32
    %16 = arith.cmpi eq, %arg1, %c0_i32_8 : i32
    %17 = arith.extui %16 : i1 to i32
    %c0_i32_9 = arith.constant 0 : i32
    %18 = arith.cmpi ne, %17, %c0_i32_9 : i32
    scf.if %18 {
      %c0 = arith.constant 0 : index
      %c0_10 = arith.constant 0 : index
      %19 = vector.load %arg4[%c0, %c0_10] : memref<8x128xf32, #tpu.memory_space<vmem>>, vector<8x128xf32>
      %20 = vector.shape_cast %19 : vector<8x128xf32> to vector<1x8x128xf32>
      %c0_11 = arith.constant 0 : index
      %c0_12 = arith.constant 0 : index
      %c0_13 = arith.constant 0 : index
      %21 = vector.load %arg3[%c0_11, %c0_12, %c0_13] : memref<1x8x128xf32, #tpu.memory_space<vmem>>, vector<1x8x128xf32>
      tpu.vector_store %arg3[%c0_11, %c0_12, %c0_13], %20 {strides = array<i32>} : memref<1x8x128xf32, #tpu.memory_space<vmem>>, vector<1x8x128xf32>,
    } else {
    }
    return
  }
  func.func @transform_0(%arg0: i32, %arg1: i32) -> (i32, i32) {
    %c1_i32 = arith.constant 1 : i32
    %0 = arith.muli %arg0, %c1_i32 : i32
    %1 = arith.addi %0, %arg1 : i32
    %c0_i32 = arith.constant 0 : i32
    %2 = arith.minsi %1, %c0_i32 : i32
    %c0_i32_0 = arith.constant 0 : i32
    %c0_i32_1 = arith.constant 0 : i32
    return %2, %c0_i32_0 : i32, i32
  }
  func.func @transform_1(%arg0: i32, %arg1: i32) -> (i32, i32, i32) {
    %c0_i32 = arith.constant 0 : i32
    %c0_i32_0 = arith.constant 0 : i32
    %c0_i32_1 = arith.constant 0 : i32
    return %arg0, %c0_i32, %c0_i32_0 : i32, i32, i32
  }
}

</mosaic_0001>

<bundles_post_ra>
// kernel: advg_loss.1
= control target key start
LH: loop header
LB: loop body
LE: loop exit
PB: predicated region body
PF: predicated region fallthrough
CT: control target
= control target key end

     0   :  { %s186_s0 = inlined_call_operand.vmem [shape: f32[16,128], index: 0, kind: input, shape index: {}]   ;;  %s187_s1 = inlined_call_operand.vmem [shape: f32[1,8,128], index: 1, kind: output, shape index: {}]  }
   0x1   :  { %v52_v0 = vld [vmem:[%s186_s0] sm:$0xff]  ;;  %v53_v1 = vld [vmem:[%s186_s0 + $0x8] sm:$0xff] }
   0x2   :  { %v54_v2 = vsub.f32 0.0, %v52_v0  ;;  %v55_v3 = vsub.f32 0.0, %v53_v1 }
   0x4   :  { %v58_v4 = vand.u32 2147483647, %v54_v2  ;;  %v59_v5 = vand.u32 2147483647, %v55_v3  ;;  %v56_v22 = vmax.f32 %v54_v2, 0.0  ;;  %v57_v25 = vmax.f32 %v55_v3, 0.0 }
   0x6   :  { %v60_v6 = vsub.f32 0.0, %v58_v4  ;;  %v61_v7 = vsub.f32 0.0, %v59_v5 }
   0x8   :  { %v62_v8 = vmul.f32 1.442695, %v60_v6  ;;  %v64_v9 = vmul.f32 1.442695, %v61_v7 }
   0xa   :  { %159 = vpow2.f32 %v62_v8 }
   0xb   :  { %161 = vpow2.f32 %v64_v9 }
  0x17   :  { %v160_v10 = vpop.eup %159 }
  0x18   :  { %v162_v11 = vpop.eup %161  ;;  %v66_v12 = vadd.f32 1.0, %v160_v10  ;;  %v69_v14 = vmul.f32 -0.5, %v160_v10  ;;  %v72_v17 = vand.u32 2147483647, %v160_v10 }
  0x19   :  { %v75_v13 = vadd.f32 1.0, %v162_v11  ;;  %v78_v15 = vmul.f32 -0.5, %v162_v11  ;;  %v81_v19 = vand.u32 2147483647, %v162_v11 }
  0x1a   :  { %163 = vlog2.f32 %v66_v12  ;;  %v70_v16 = vadd.f32 1.0, %v69_v14  ;;  %vm73_vm0 = vcmp.lt.f32.partialorder %v72_v17, 0.0004427343 }
  0x1b   :  { %165 = vlog2.f32 %v75_v13  ;;  %v79_v18 = vadd.f32 1.0, %v78_v15  ;;  %vm82_vm1 = vcmp.lt.f32.partialorder %v81_v19, 0.0004427343 }
  0x1c   :  { %v71_v20 = vmul.f32 %v160_v10, %v70_v16 }
  0x1d   :  { %v80_v23 = vmul.f32 %v162_v11, %v79_v18 }
  0x27   :  { %v164_v21 = vpop.eup %163 }
  0x28   :  { %v166_v24 = vpop.eup %165  ;;  %v68_v26 = vmul.f32 0.6931472, %v164_v21 }
  0x29   :  { %v77_v27 = vmul.f32 0.6931472, %v166_v24 }
  0x2a   :  { %v74_v28 = vsel %vm73_vm0, %v71_v20, %v68_v26 }
  0x2b   :  { %v83_v29 = vsel %vm82_vm1, %v80_v23, %v77_v27  ;;  %v84_v30 = vadd.f32 %v74_v28, %v56_v22 }
  0x2c   :  { %v85_v31 = vadd.f32 %v83_v29, %v57_v25 }
  0x2e   :  { %v87_v32 = vadd.f32 %v85_v31, %v84_v30 }
  0x30   :  { %148 = vst [vmem:[%s187_s1] sm:$0xff] %v87_v32 }

</bundles_post_ra>
